<compile_context>
chip_gen: v5e
topology: v5e:2x2
jax: 0.10.0
libtpu: 0.0.40
codegen_flags: <defaults>
</compile_context>

<pallas_src>
import functools

import jax
import jax.numpy as jnp
from jax.experimental import pallas as pl
from jax.experimental.pallas import tpu as pltpu

LATENT_DIM = 2
IN_DIM = LATENT_DIM + 10   # 12
H1 = 512
H2 = 256
OUT_DIM = 1
BN_EPS = 1e-5
LEAKY_SLOPE = 0.01         # PyTorch nn.LeakyReLU default

DEFAULT_TILE_B = 1024                  # larger tiles amortize ~0.35us/grid-step
DEFAULT_VMEM_LIMIT = 48 * 1024 * 1024  # safe under v7x's 64 MiB physical VMEM
SINGLE_PASS_MAX_B = 4096               # whole-batch activations fit VMEM below this
ACT_CACHE_BUDGET = 20 * 1024 * 1024    # VMEM budget for z1/z2 caches (tiled path)


def _round_up(n, m):
    return ((n + m - 1) // m) * m


def _leaky(v):
    return jnp.where(v >= 0, v, LEAKY_SLOPE * v)


# ----------------------------------------------------------------------------
# Single-pass kernel: whole batch resident in VMEM, grid of 1.
# ----------------------------------------------------------------------------
def _single_pass_kernel(
    x_ref,
    w1_ref, g1_ref, be1_ref,
    w2_ref, g2_ref, be2_ref,
    w3_ref, b3_ref,
    out_ref,
    *, batch, matmul_dtype,
):
    inv_n = 1.0 / float(batch)

    # Linear(12 -> 512); bias b1 dropped (cancelled exactly by BN mean subtraction).
    x = x_ref[...].astype(matmul_dtype)
    z1 = jnp.dot(x, w1_ref[...], preferred_element_type=jnp.float32)

    # BatchNorm1d(512), training mode, two-pass (centered) variance.
    mean1 = jnp.sum(z1, axis=0, keepdims=True) * inv_n
    c1 = z1 - mean1
    var1 = jnp.sum(c1 * c1, axis=0, keepdims=True) * inv_n
    a1 = _leaky(c1 * (g1_ref[...] * jax.lax.rsqrt(var1 + BN_EPS)) + be1_ref[...])

    # Linear(512 -> 256); bias b2 dropped.
    z2 = jnp.dot(a1.astype(matmul_dtype), w2_ref[...],
                 preferred_element_type=jnp.float32)

    # BatchNorm1d(256), training mode.
    mean2 = jnp.sum(z2, axis=0, keepdims=True) * inv_n
    c2 = z2 - mean2
    var2 = jnp.sum(c2 * c2, axis=0, keepdims=True) * inv_n
    a2 = _leaky(c2 * (g2_ref[...] * jax.lax.rsqrt(var2 + BN_EPS)) + be2_ref[...])

    # Linear(256 -> 1): N=1 wastes the MXU; VPU multiply + lane reduction.
    logit = jnp.sum(a2 * w3_ref[...], axis=-1, keepdims=True) + b3_ref[...]
    out_ref[...] = jax.nn.sigmoid(logit).astype(out_ref.dtype)


# ----------------------------------------------------------------------------
# Tiled 3-phase kernel for large batches (cross-tile BN statistics).
#   phase 0: accumulate BN1 stats of z1 = x @ W1   (optionally cache z1)
#   phase 1: fold BN1, a1, z2 = a1 @ W2, accumulate BN2 stats (optionally cache z2)
#   phase 2: fold BN2, compute sigmoid output tile
# ----------------------------------------------------------------------------
def _tiled_kernel(
    x_ref,
    w1_ref, g1_ref, be1_ref,
    w2_ref, g2_ref, be2_ref,
    w3_ref, b3_ref,
    out_ref,
    *scratch,
    batch, tile_b, needs_mask, cache_z1, cache_z2, matmul_dtype,
):
    s1_ref, q1_ref, s2_ref, q2_ref = scratch[:4]
    idx = 4
    z1_cache = None
    z2_cache = None
    if cache_z1:
        z1_cache = scratch[idx]; idx += 1
    if cache_z2:
        z2_cache = scratch[idx]; idx += 1

    p = pl.program_id(0)   # phase
    i = pl.program_id(1)   # batch tile
    row0 = pl.multiple_of(i * tile_b, tile_b)

    if needs_mask:
        row = i * tile_b + jax.lax.broadcasted_iota(jnp.int32, (tile_b, 1), 0)
        mask = (row < batch).astype(jnp.float32)
    else:
        mask = None

    inv_n = 1.0 / float(batch)

    def masked(z):
        return z if mask is None else z * mask

    def compute_z1():
        # Bias b1 dropped (cancelled exactly by train-mode BN mean subtraction).
        return jnp.dot(x_ref[...].astype(matmul_dtype), w1_ref[...],
                       preferred_element_type=jnp.float32)

    def fold_bn(s_ref, q_ref, gamma, beta):
        # One-pass stats: mean = sum/N, biased var = E[z^2] - mean^2 (clamped).
        mean = s_ref[...] * inv_n
        var = jnp.maximum(q_ref[...] * inv_n - mean * mean, 0.0)
        scale = gamma * jax.lax.rsqrt(var + BN_EPS)
        shift = beta - mean * scale
        return scale, shift

    def layer1_acts(z1):
        scale1, shift1 = fold_bn(s1_ref, q1_ref, g1_ref[...], be1_ref[...])
        return _leaky(z1 * scale1 + shift1)

    def compute_z2(a1):
        # Bias b2 dropped (cancelled by BN2 mean subtraction).
        return jnp.dot(a1.astype(matmul_dtype), w2_ref[...],
                       preferred_element_type=jnp.float32)

    # ---- phase 0: BN1 statistics over the whole batch ----
    @pl.when(p == 0)
    def _():
        @pl.when(i == 0)
        def _():
            s1_ref[...] = jnp.zeros_like(s1_ref)
            q1_ref[...] = jnp.zeros_like(q1_ref)
        z1 = compute_z1()
        if cache_z1:
            z1_cache[pl.ds(row0, tile_b), :] = z1
        zm = masked(z1)
        s1_ref[...] += jnp.sum(zm, axis=0, keepdims=True)
        q1_ref[...] += jnp.sum(zm * z1, axis=0, keepdims=True)

    # ---- phase 1: BN1 final; compute z2, accumulate BN2 statistics ----
    @pl.when(p == 1)
    def _():
        @pl.when(i == 0)
        def _():
            s2_ref[...] = jnp.zeros_like(s2_ref)
            q2_ref[...] = jnp.zeros_like(q2_ref)
        z1 = z1_cache[pl.ds(row0, tile_b), :] if cache_z1 else compute_z1()
        z2 = compute_z2(layer1_acts(z1))
        if cache_z2:
            z2_cache[pl.ds(row0, tile_b), :] = z2
        zm2 = masked(z2)
        s2_ref[...] += jnp.sum(zm2, axis=0, keepdims=True)
        q2_ref[...] += jnp.sum(zm2 * z2, axis=0, keepdims=True)

    # ---- phase 2: BN2 final; output tile.  (out_ref holds garbage in earlier
    # phases; correct because the phase axis is outermost so this write is last
    # per tile.) ----
    @pl.when(p == 2)
    def _():
        if cache_z2:
            z2 = z2_cache[pl.ds(row0, tile_b), :]
        else:
            z1 = z1_cache[pl.ds(row0, tile_b), :] if cache_z1 else compute_z1()
            z2 = compute_z2(layer1_acts(z1))
        scale2, shift2 = fold_bn(s2_ref, q2_ref, g2_ref[...], be2_ref[...])
        a2 = _leaky(z2 * scale2 + shift2)
        logit = jnp.sum(a2 * w3_ref[...], axis=-1, keepdims=True) + b3_ref[...]
        out_ref[...] = jax.nn.sigmoid(logit).astype(out_ref.dtype)


# ----------------------------------------------------------------------------
# Wrapper
# ----------------------------------------------------------------------------
def aae_supervised_discriminator(
    x, params, *,
    tile_b=DEFAULT_TILE_B,
    matmul_dtype=jnp.bfloat16,
    single_pass_max_rows=SINGLE_PASS_MAX_B,
    act_cache_budget=ACT_CACHE_BUDGET,
    vmem_limit_bytes=DEFAULT_VMEM_LIMIT,
    force_tiled=False,
):
    """x: (B, latent_dim + 10) float32. Returns (B, 1) float32.

    matmul_dtype=jnp.bfloat16 (default) uses the bf16-native MXU path;
    matmul_dtype=jnp.float32 reproduces the PyTorch module to ~1e-5.
    """
    B = x.shape[0]
    x = x.astype(jnp.float32)

    w1 = params["w1"].astype(matmul_dtype)
    w2 = params["w2"].astype(matmul_dtype)
    w3_row = params["w3"].reshape(1, H2).astype(jnp.float32)
    param_args = (w1, params["g1"], params["be1"],
                  w2, params["g2"], params["be2"],
                  w3_row, params["b3"])

    compiler_params = pltpu.CompilerParams(
        # Both axes carry cross-iteration dependencies (phase ordering, VMEM
        # stat accumulators / caches) so they must stay "arbitrary".
        dimension_semantics=("arbitrary",),
        vmem_limit_bytes=vmem_limit_bytes,
    )

    # ---------------- single-pass fast path ----------------
    if not force_tiled and B <= single_pass_max_rows:
        kernel = functools.partial(
            _single_pass_kernel, batch=B, matmul_dtype=matmul_dtype)
        const = lambda i: (0, 0)
        grid_spec = pltpu.PrefetchScalarGridSpec(
            num_scalar_prefetch=0,
            grid=(1,),
            in_specs=[
                pl.BlockSpec((B, IN_DIM), const),       # x (whole batch)
                pl.BlockSpec((IN_DIM, H1), const),      # w1
                pl.BlockSpec((1, H1), const),           # gamma1
                pl.BlockSpec((1, H1), const),           # beta1
                pl.BlockSpec((H1, H2), const),          # w2
                pl.BlockSpec((1, H2), const),           # gamma2
                pl.BlockSpec((1, H2), const),           # beta2
                pl.BlockSpec((1, H2), const),           # w3 (row)
                pl.BlockSpec((1, OUT_DIM), const),      # b3
            ],
            out_specs=pl.BlockSpec((B, OUT_DIM), const),
        )
        return pl.pallas_call(
            kernel,
            out_shape=jax.ShapeDtypeStruct((B, OUT_DIM), jnp.float32),
            grid_spec=grid_spec,
            compiler_params=compiler_params,
        )(x, *param_args)

    # ---------------- tiled 3-phase path ----------------
    tile_b = min(tile_b, _round_up(B, 8))
    b_pad = _round_up(B, tile_b)
    nb = b_pad // tile_b
    if b_pad != B:
        # Zero-pad so out-of-range rows are finite; multiply-masking of the BN
        # statistics stays exact.
        x = jnp.pad(x, ((0, b_pad - B), (0, 0)))

    # Decide which activations to cache in VMEM (z2 prioritized: it replaces
    # the dominant 512x256 matmul recompute).  Fallback is full recompute,
    # which is the better trade on low-HBM-bandwidth parts (v5e).
    budget = int(act_cache_budget)
    z2_bytes = b_pad * H2 * 4
    z1_bytes = b_pad * H1 * 4
    cache_z2 = z2_bytes <= budget
    if cache_z2:
        budget -= z2_bytes
    cache_z1 = z1_bytes <= budget

    scratch_shapes = [
        pltpu.VMEM((1, H1), jnp.float32),   # sum(z1)
        pltpu.VMEM((1, H1), jnp.float32),   # sum(z1^2)
        pltpu.VMEM((1, H2), jnp.float32),   # sum(z2)
        pltpu.VMEM((1, H2), jnp.float32),   # sum(z2^2)
    ]
    if cache_z1:
        scratch_shapes.append(pltpu.VMEM((b_pad, H1), jnp.float32))
    if cache_z2:
        scratch_shapes.append(pltpu.VMEM((b_pad, H2), jnp.float32))

    kernel = functools.partial(
        _tiled_kernel,
        batch=B, tile_b=tile_b, needs_mask=(b_pad != B),
        cache_z1=cache_z1, cache_z2=cache_z2, matmul_dtype=matmul_dtype)

    const = lambda p, i: (0, 0)   # params: DMA once, stay VMEM-resident
    grid_spec = pltpu.PrefetchScalarGridSpec(
        num_scalar_prefetch=0,
        grid=(3, nb),
        in_specs=[
            pl.BlockSpec((tile_b, IN_DIM), lambda p, i: (i, 0)),   # x tile
            pl.BlockSpec((IN_DIM, H1), const),                     # w1
            pl.BlockSpec((1, H1), const),                          # gamma1
            pl.BlockSpec((1, H1), const),                          # beta1
            pl.BlockSpec((H1, H2), const),                         # w2
            pl.BlockSpec((1, H2), const),                          # gamma2
            pl.BlockSpec((1, H2), const),                          # beta2
            pl.BlockSpec((1, H2), const),                          # w3 (row)
            pl.BlockSpec((1, OUT_DIM), const),                     # b3
        ],
        out_specs=pl.BlockSpec((tile_b, OUT_DIM), lambda p, i: (i, 0)),
        scratch_shapes=scratch_shapes,
    )
    out = pl.pallas_call(
        kernel,
        out_shape=jax.ShapeDtypeStruct((b_pad, OUT_DIM), jnp.float32),
        grid_spec=grid_spec,
        compiler_params=pltpu.CompilerParams(
            dimension_semantics=("arbitrary", "arbitrary"),
            vmem_limit_bytes=vmem_limit_bytes,
        ),
    )(x, *param_args)
    return out[:B]


# ----------------------------------------------------------------------------
# Parameter init + pure-JAX reference
# ----------------------------------------------------------------------------
def init_params(key):
    """Parameter init mirroring the PyTorch module's shapes.

    Linear weights are stored as (in_features, out_features) so the kernel
    computes x @ W.  b1/b2 are created (and used in the reference) but are not
    passed to the kernel: train-mode BN cancels them exactly.
    """
    ks = jax.random.split(key, 8)

    def lin_init(k, fan_in, fan_out):
        bound = 1.0 / jnp.sqrt(fan_in)
        kw, kb = jax.random.split(k)
        w = jax.random.uniform(kw, (fan_in, fan_out), jnp.float32, -bound, bound)
        b = jax.random.uniform(kb, (1, fan_out), jnp.float32, -bound, bound)
        return w, b

    w1, b1 = lin_init(ks[0], IN_DIM, H1)
    w2, b2 = lin_init(ks[1], H1, H2)
    w3, b3 = lin_init(ks[2], H2, OUT_DIM)

    g1 = 1.0 + 0.1 * jax.random.normal(ks[3], (1, H1), jnp.float32)
    be1 = 0.1 * jax.random.normal(ks[4], (1, H1), jnp.float32)
    g2 = 1.0 + 0.1 * jax.random.normal(ks[5], (1, H2), jnp.float32)
    be2 = 0.1 * jax.random.normal(ks[6], (1, H2), jnp.float32)

    return dict(
        w1=w1, b1=b1, g1=g1, be1=be1,
        w2=w2, b2=b2, g2=g2, be2=be2,
        w3=w3, b3=b3,
    )


def _reference(x, p):
    """Pure-JAX reference matching the PyTorch module (train-mode BN)."""
    def bn(h, g, b):
        m = jnp.mean(h, axis=0, keepdims=True)
        v = jnp.mean((h - m) ** 2, axis=0, keepdims=True)
        return (h - m) / jnp.sqrt(v + BN_EPS) * g + b

    h = _leaky(bn(x @ p["w1"] + p["b1"], p["g1"], p["be1"]))
    h = _leaky(bn(h @ p["w2"] + p["b2"], p["g2"], p["be2"]))
    return jax.nn.sigmoid(h @ p["w3"] + p["b3"])


if __name__ == "__main__":
    key = jax.random.PRNGKey(0)
    k_params, k_x1, k_x2, k_x3 = jax.random.split(key, 4)
    params = init_params(k_params)

    # 1) Small batch, f32, single-pass fast path: exact check.
    B1 = 8
    x1 = jax.random.normal(k_x1, (B1, IN_DIM), jnp.float32)
    out1 = jax.block_until_ready(
        aae_supervised_discriminator(x1, params, matmul_dtype=jnp.float32))
    ref1 = _reference(x1, params)
    assert out1.shape == (B1, OUT_DIM)
    assert jnp.allclose(out1, ref1, atol=1e-5, rtol=1e-5), (out1, ref1)

    # 2) Odd-sized batch, f32, single-pass fast path.
    B2 = 200
    x2 = jax.random.normal(k_x2, (B2, IN_DIM), jnp.float32)
    out2 = jax.block_until_ready(
        aae_supervised_discriminator(x2, params, matmul_dtype=jnp.float32))
    ref2 = _reference(x2, params)
    assert out2.shape == (B2, OUT_DIM)
    assert jnp.allclose(out2, ref2, atol=1e-5, rtol=1e-5), (out2, ref2)

    # 3) Force the tiled 3-phase path with VMEM activation caches
    #    (exercises cross-tile BN stats + z1/z2 caching + padding mask).
    out3 = jax.block_until_ready(
        aae_supervised_discriminator(
            x2, params, matmul_dtype=jnp.float32, force_tiled=True, tile_b=64))
    assert out3.shape == (B2, OUT_DIM)
    assert jnp.allclose(out3, ref2, atol=1e-5, rtol=1e-5), (out3, ref2)

    # 4) Tiled path, recompute fallback (activation caches disabled).
    out4 = jax.block_until_ready(
        aae_supervised_discriminator(
            x2, params, matmul_dtype=jnp.float32, force_tiled=True, tile_b=64,
            act_cache_budget=0))
    assert out4.shape == (B2, OUT_DIM)
    assert jnp.allclose(out4, ref2, atol=1e-5, rtol=1e-5), (out4, ref2)

    # 5) Default bf16 MXU path (performance default): looser tolerance.
    B3 = 256
    x3 = jax.random.normal(k_x3, (B3, IN_DIM), jnp.float32)
    out5 = jax.block_until_ready(aae_supervised_discriminator(x3, params))
    ref5 = _reference(x3, params)
    assert out5.shape == (B3, OUT_DIM)
    assert jnp.all(jnp.isfinite(out5))
    assert jnp.allclose(out5, ref5, atol=2e-2), (out5, ref5)

    print("KERNEL_OK")
</pallas_src>

<mosaic_0001>
module attributes {stable_mosaic.version = 11 : i64} {
  func.func @_single_pass_kernel(%arg0: i32, %arg1: memref<8x12xf32, #tpu.memory_space<vmem>>, %arg2: memref<12x512xf32, #tpu.memory_space<vmem>>, %arg3: memref<1x512xf32, #tpu.memory_space<vmem>>, %arg4: memref<1x512xf32, #tpu.memory_space<vmem>>, %arg5: memref<512x256xf32, #tpu.memory_space<vmem>>, %arg6: memref<1x256xf32, #tpu.memory_space<vmem>>, %arg7: memref<1x256xf32, #tpu.memory_space<vmem>>, %arg8: memref<1x256xf32, #tpu.memory_space<vmem>>, %arg9: memref<1x1xf32, #tpu.memory_space<vmem>>, %arg10: memref<8x1xf32, #tpu.memory_space<vmem>>) attributes {dimension_semantics = [#tpu.dimension_semantics<arbitrary>], iteration_bounds = array<i64: 1>, scalar_prefetch = 0 : i64, scratch_operands = 0 : i64, tpu.core_type = #tpu.core_type<tc>, window_params = [{pipeline_mode = #tpu.pipeline_mode<synchronous>, transform_indices = @transform_0, window_bounds = array<i64: 8, 12>}, {pipeline_mode = #tpu.pipeline_mode<synchronous>, transform_indices = @transform_1, window_bounds = array<i64: 12, 512>}, {pipeline_mode = #tpu.pipeline_mode<synchronous>, transform_indices = @transform_2, window_bounds = array<i64: 1, 512>}, {pipeline_mode = #tpu.pipeline_mode<synchronous>, transform_indices = @transform_3, window_bounds = array<i64: 1, 512>}, {pipeline_mode = #tpu.pipeline_mode<synchronous>, transform_indices = @transform_4, window_bounds = array<i64: 512, 256>}, {pipeline_mode = #tpu.pipeline_mode<synchronous>, transform_indices = @transform_5, window_bounds = array<i64: 1, 256>}, {pipeline_mode = #tpu.pipeline_mode<synchronous>, transform_indices = @transform_6, window_bounds = array<i64: 1, 256>}, {pipeline_mode = #tpu.pipeline_mode<synchronous>, transform_indices = @transform_7, window_bounds = array<i64: 1, 256>}, {pipeline_mode = #tpu.pipeline_mode<synchronous>, transform_indices = @transform_8, window_bounds = array<i64: 1, 1>}, {pipeline_mode = #tpu.pipeline_mode<synchronous>, transform_indices = @transform_9, window_bounds = array<i64: 8, 1>}]} {
    %c0 = arith.constant 0 : index
    %c0_0 = arith.constant 0 : index
    %0 = vector.load %arg1[%c0, %c0_0] : memref<8x12xf32, #tpu.memory_space<vmem>>, vector<8x12xf32>
    %c0_1 = arith.constant 0 : index
    %c0_2 = arith.constant 0 : index
    %1 = vector.load %arg2[%c0_1, %c0_2] : memref<12x512xf32, #tpu.memory_space<vmem>>, vector<12x512xf32>
    %cst = arith.constant dense<0.000000e+00> : vector<8x512xf32>
    %2 = tpu.matmul %0, %1, %cst {dimension_numbers = #tpu.dot_dimension_numbers<[1], [0], [0], [1], [0, 0, 1, 1], [], []>} : vector<8x12xf32>, vector<12x512xf32>, vector<8x512xf32> -> vector<8x512xf32>
    %cst_3 = arith.constant dense<0.000000e+00> : vector<512xf32>
    %3 = vector.multi_reduction <add>, %2, %cst_3 [0] : vector<8x512xf32> to vector<512xf32>
    %4 = vector.shape_cast %3 : vector<512xf32> to vector<1x512xf32>
    %cst_4 = arith.constant 1.250000e-01 : f32
    %5 = vector.broadcast %cst_4 : f32 to vector<1x512xf32>
    %6 = arith.mulf %4, %5 : vector<1x512xf32>
    %7 = vector.broadcast %6 : vector<1x512xf32> to vector<8x512xf32>
    %8 = arith.subf %2, %7 : vector<8x512xf32>
    %9 = arith.mulf %8, %8 : vector<8x512xf32>
    %cst_5 = arith.constant dense<0.000000e+00> : vector<512xf32>
    %10 = vector.multi_reduction <add>, %9, %cst_5 [0] : vector<8x512xf32> to vector<512xf32>
    %11 = vector.shape_cast %10 : vector<512xf32> to vector<1x512xf32>
    %cst_6 = arith.constant 1.250000e-01 : f32
    %12 = vector.broadcast %cst_6 : f32 to vector<1x512xf32>
    %13 = arith.mulf %11, %12 : vector<1x512xf32>
    %c0_7 = arith.constant 0 : index
    %c0_8 = arith.constant 0 : index
    %14 = vector.load %arg3[%c0_7, %c0_8] : memref<1x512xf32, #tpu.memory_space<vmem>>, vector<1x512xf32>
    %cst_9 = arith.constant 9.99999974E-6 : f32
    %15 = vector.broadcast %cst_9 : f32 to vector<1x512xf32>
    %16 = arith.addf %13, %15 : vector<1x512xf32>
    %17 = math.rsqrt %16 : vector<1x512xf32>
    %18 = arith.mulf %14, %17 : vector<1x512xf32>
    %19 = vector.broadcast %18 : vector<1x512xf32> to vector<8x512xf32>
    %20 = arith.mulf %8, %19 : vector<8x512xf32>
    %c0_10 = arith.constant 0 : index
    %c0_11 = arith.constant 0 : index
    %21 = vector.load %arg4[%c0_10, %c0_11] : memref<1x512xf32, #tpu.memory_space<vmem>>, vector<1x512xf32>
    %22 = vector.broadcast %21 : vector<1x512xf32> to vector<8x512xf32>
    %23 = arith.addf %20, %22 : vector<8x512xf32>
    %cst_12 = arith.constant 0.000000e+00 : f32
    %24 = vector.broadcast %cst_12 : f32 to vector<8x512xf32>
    %25 = arith.cmpf oge, %23, %24 : vector<8x512xf32>
    %cst_13 = arith.constant 0.00999999977 : f32
    %26 = vector.broadcast %cst_13 : f32 to vector<8x512xf32>
    %27 = arith.mulf %26, %23 : vector<8x512xf32>
    %28 = arith.select %25, %23, %27 : vector<8x512xi1>, vector<8x512xf32>
    %c0_14 = arith.constant 0 : index
    %c0_15 = arith.constant 0 : index
    %29 = vector.load %arg5[%c0_14, %c0_15] : memref<512x256xf32, #tpu.memory_space<vmem>>, vector<512x256xf32>
    %cst_16 = arith.constant dense<0.000000e+00> : vector<8x256xf32>
    %30 = tpu.matmul %28, %29, %cst_16 {dimension_numbers = #tpu.dot_dimension_numbers<[1], [0], [0], [1], [0, 0, 1, 1], [], []>} : vector<8x512xf32>, vector<512x256xf32>, vector<8x256xf32> -> vector<8x256xf32>
    %cst_17 = arith.constant dense<0.000000e+00> : vector<256xf32>
    %31 = vector.multi_reduction <add>, %30, %cst_17 [0] : vector<8x256xf32> to vector<256xf32>
    %32 = vector.shape_cast %31 : vector<256xf32> to vector<1x256xf32>
    %cst_18 = arith.constant 1.250000e-01 : f32
    %33 = vector.broadcast %cst_18 : f32 to vector<1x256xf32>
    %34 = arith.mulf %32, %33 : vector<1x256xf32>
    %35 = vector.broadcast %34 : vector<1x256xf32> to vector<8x256xf32>
    %36 = arith.subf %30, %35 : vector<8x256xf32>
    %37 = arith.mulf %36, %36 : vector<8x256xf32>
    %cst_19 = arith.constant dense<0.000000e+00> : vector<256xf32>
    %38 = vector.multi_reduction <add>, %37, %cst_19 [0] : vector<8x256xf32> to vector<256xf32>
    %39 = vector.shape_cast %38 : vector<256xf32> to vector<1x256xf32>
    %cst_20 = arith.constant 1.250000e-01 : f32
    %40 = vector.broadcast %cst_20 : f32 to vector<1x256xf32>
    %41 = arith.mulf %39, %40 : vector<1x256xf32>
    %c0_21 = arith.constant 0 : index
    %c0_22 = arith.constant 0 : index
    %42 = vector.load %arg6[%c0_21, %c0_22] : memref<1x256xf32, #tpu.memory_space<vmem>>, vector<1x256xf32>
    %cst_23 = arith.constant 9.99999974E-6 : f32
    %43 = vector.broadcast %cst_23 : f32 to vector<1x256xf32>
    %44 = arith.addf %41, %43 : vector<1x256xf32>
    %45 = math.rsqrt %44 : vector<1x256xf32>
    %46 = arith.mulf %42, %45 : vector<1x256xf32>
    %47 = vector.broadcast %46 : vector<1x256xf32> to vector<8x256xf32>
    %48 = arith.mulf %36, %47 : vector<8x256xf32>
    %c0_24 = arith.constant 0 : index
    %c0_25 = arith.constant 0 : index
    %49 = vector.load %arg7[%c0_24, %c0_25] : memref<1x256xf32, #tpu.memory_space<vmem>>, vector<1x256xf32>
    %50 = vector.broadcast %49 : vector<1x256xf32> to vector<8x256xf32>
    %51 = arith.addf %48, %50 : vector<8x256xf32>
    %cst_26 = arith.constant 0.000000e+00 : f32
    %52 = vector.broadcast %cst_26 : f32 to vector<8x256xf32>
    %53 = arith.cmpf oge, %51, %52 : vector<8x256xf32>
    %cst_27 = arith.constant 0.00999999977 : f32
    %54 = vector.broadcast %cst_27 : f32 to vector<8x256xf32>
    %55 = arith.mulf %54, %51 : vector<8x256xf32>
    %56 = arith.select %53, %51, %55 : vector<8x256xi1>, vector<8x256xf32>
    %c0_28 = arith.constant 0 : index
    %c0_29 = arith.constant 0 : index
    %57 = vector.load %arg8[%c0_28, %c0_29] : memref<1x256xf32, #tpu.memory_space<vmem>>, vector<1x256xf32>
    %58 = vector.broadcast %57 : vector<1x256xf32> to vector<8x256xf32>
    %59 = arith.mulf %56, %58 : vector<8x256xf32>
    %cst_30 = arith.constant dense<0.000000e+00> : vector<8xf32>
    %60 = vector.multi_reduction <add>, %59, %cst_30 [1] : vector<8x256xf32> to vector<8xf32>
    %61 = vector.shape_cast %60 : vector<8xf32> to vector<8x1xf32>
    %c0_31 = arith.constant 0 : index
    %c0_32 = arith.constant 0 : index
    %62 = vector.load %arg9[%c0_31, %c0_32] : memref<1x1xf32, #tpu.memory_space<vmem>>, vector<1x1xf32>
    %63 = vector.broadcast %62 : vector<1x1xf32> to vector<8x1xf32>
    %64 = arith.addf %61, %63 : vector<8x1xf32>
    %65 = arith.negf %64 : vector<8x1xf32>
    %66 = math.exp %65 : vector<8x1xf32>
    %cst_33 = arith.constant 1.000000e+00 : f32
    %67 = vector.broadcast %cst_33 : f32 to vector<8x1xf32>
    %68 = arith.addf %67, %66 : vector<8x1xf32>
    %69 = arith.divf %67, %68 : vector<8x1xf32>
    %c0_34 = arith.constant 0 : index
    %c0_35 = arith.constant 0 : index
    %70 = vector.load %arg10[%c0_34, %c0_35] : memref<8x1xf32, #tpu.memory_space<vmem>>, vector<8x1xf32>
    tpu.vector_store %arg10[%c0_34, %c0_35], %69 {strides = array<i32>} : memref<8x1xf32, #tpu.memory_space<vmem>>, vector<8x1xf32>,
    return
  }
  func.func @transform_0(%arg0: i32) -> (i32, i32) {
    %c0_i32 = arith.constant 0 : i32
    %c0_i32_0 = arith.constant 0 : i32
    %c0_i32_1 = arith.constant 0 : i32
    return %c0_i32, %c0_i32_0 : i32, i32
  }
  func.func @transform_1(%arg0: i32) -> (i32, i32) {
    %c0_i32 = arith.constant 0 : i32
    %c0_i32_0 = arith.constant 0 : i32
    %c0_i32_1 = arith.constant 0 : i32
    return %c0_i32, %c0_i32_0 : i32, i32
  }
  func.func @transform_2(%arg0: i32) -> (i32, i32) {
    %c0_i32 = arith.constant 0 : i32
    %c0_i32_0 = arith.constant 0 : i32
    %c0_i32_1 = arith.constant 0 : i32
    return %c0_i32, %c0_i32_0 : i32, i32
  }
  func.func @transform_3(%arg0: i32) -> (i32, i32) {
    %c0_i32 = arith.constant 0 : i32
    %c0_i32_0 = arith.constant 0 : i32
    %c0_i32_1 = arith.constant 0 : i32
    return %c0_i32, %c0_i32_0 : i32, i32
  }
  func.func @transform_4(%arg0: i32) -> (i32, i32) {
    %c0_i32 = arith.constant 0 : i32
    %c0_i32_0 = arith.constant 0 : i32
    %c0_i32_1 = arith.constant 0 : i32
    return %c0_i32, %c0_i32_0 : i32, i32
  }
  func.func @transform_5(%arg0: i32) -> (i32, i32) {
    %c0_i32 = arith.constant 0 : i32
    %c0_i32_0 = arith.constant 0 : i32
    %c0_i32_1 = arith.constant 0 : i32
    return %c0_i32, %c0_i32_0 : i32, i32
  }
  func.func @transform_6(%arg0: i32) -> (i32, i32) {
    %c0_i32 = arith.constant 0 : i32
    %c0_i32_0 = arith.constant 0 : i32
    %c0_i32_1 = arith.constant 0 : i32
    return %c0_i32, %c0_i32_0 : i32, i32
  }
  func.func @transform_7(%arg0: i32) -> (i32, i32) {
    %c0_i32 = arith.constant 0 : i32
    %c0_i32_0 = arith.constant 0 : i32
    %c0_i32_1 = arith.constant 0 : i32
    return %c0_i32, %c0_i32_0 : i32, i32
  }
  func.func @transform_8(%arg0: i32) -> (i32, i32) {
    %c0_i32 = arith.constant 0 : i32
    %c0_i32_0 = arith.constant 0 : i32
    %c0_i32_1 = arith.constant 0 : i32
    return %c0_i32, %c0_i32_0 : i32, i32
  }
  func.func @transform_9(%arg0: i32) -> (i32, i32) {
    %c0_i32 = arith.constant 0 : i32
    %c0_i32_0 = arith.constant 0 : i32
    %c0_i32_1 = arith.constant 0 : i32
    return %c0_i32, %c0_i32_0 : i32, i32
  }
}

</mosaic_0001>

<bundles_post_ra>
// kernel: tpu_custom_call.1
= control target key start
LH: loop header
LB: loop body
LE: loop exit
PB: predicated region body
PF: predicated region fallthrough
CT: control target
= control target key end

     0   :  { %s1115_s0 = inlined_call_operand.hbm [shape: f32[8,12], index: 0, kind: input, shape index: {}]   ;;  %s1116_s1 = inlined_call_operand.hbm [shape: f32[12,512], index: 1, kind: input, shape index: {}]   ;;  %s1117_s2 = inlined_call_operand.hbm [shape: f32[1,512], index: 2, kind: input, shape index: {}]   ;;  %s1118_s3 = inlined_call_operand.vmem [shape: f32[1,512], index: 3, kind: input, shape index: {}]   ;;  %s1119_s4 = inlined_call_operand.hbm [shape: f32[512,256], index: 4, kind: input, shape index: {}]   ;;  %s1120_s5 = inlined_call_operand.vmem [shape: f32[1,256], index: 5, kind: input, shape index: {}]   ;;  %s1121_s6 = inlined_call_operand.hbm [shape: f32[1,256], index: 6, kind: input, shape index: {}]   ;;  %s1122_s7 = inlined_call_operand.vmem [shape: f32[1,256], index: 7, kind: input, shape index: {}]   ;;  %s1123_s8 = inlined_call_operand.<no memory space> [shape: f32[1,1], index: 8, kind: input, shape index: {}]   ;;  %s1124_s9 = inlined_call_operand.vmem [shape: f32[8,1], index: 9, kind: output, shape index: {}]  }
   0x1   :  { %v14_v0 = vstv %s1123_s8 }
   0x2   :  { %15 = vst [vmem:[#allocation2] sm:$0x1] %v14_v0 }
   0x3   :  { %16 = vsyncpa [#allocation4], 0 }
   0x4   :  { %17 = vsyncpa [#allocation6], 0  ;;  %s34_s13 = sshll.u32 %s1116_s1, 4  ;;  %s35_s13 = int_to_ptr.hbm [resolvable:$true] %s34_s13 }
   0x5   :  { %18 = vsyncpa [#allocation9], 0  ;;  %s950_s14 = smov [#allocation5]   ;;  %s60_s18 = sshll.u32 %s1119_s4, 4  ;;  %s61_s18 = int_to_ptr.hbm [resolvable:$true] %s60_s18 }
   0x6   :  { %s36_s15 = sshll.u32 %s950_s14, 4  ;;  %s951_s19 = smov 512   ;;  %s37_s15 = int_to_ptr.vmem [resolvable:$true] %s36_s15 }
   0x7   :  { %s952_s20 = smov 32   ;;  %s953_s8 = smov [#allocation8]  }
   0x8   :  { %42 = dma.hbm_to_vmem [thread:$0]  %s35_s13, 1024, %s37_s15, [#allocation6], %s951_s19, %s951_s19, %s952_s20  }
   0x9   :  { %s62_s21 = sshll.u32 %s953_s8, 4  ;;  %s954_s22 = smov 256   ;;  %s63_s21 = int_to_ptr.vmem [resolvable:$true] %s62_s21 }
   0xa   :  { %s955_s23 = smov 16   ;;  %s24_s25 = sshll.u32 %s1115_s0, 4  ;;  %s25_s25 = int_to_ptr.hbm [resolvable:$true] %s24_s25 }
   0xb   :  { %68 = dma.hbm_to_vmem [thread:$0]  %s61_s18, 16384, %s63_s21, [#allocation9], %s954_s22, %s954_s22, %s955_s23  }
   0xc   :  { %s956_s26 = smov [#allocation3]   ;;  %s48_s29 = sshll.u32 %s1117_s2, 4  ;;  %s49_s29 = int_to_ptr.hbm [resolvable:$true] %s48_s29 }
   0xd   :  { %s26_s27 = sshll.u32 %s956_s26, 4  ;;  %s957_s30 = smov [#allocation7]   ;;  %s27_s27 = int_to_ptr.vmem [resolvable:$true] %s26_s27 }
   0xe   :  { %29 = dma.hbm_to_vmem [thread:$0]  %s25_s25, 128, %s27_s27, [#allocation4]  }
   0xf   :  { %s50_s10 = sshll.u32 %s957_s30, 4  ;;  %s76_s13 = sshll.u32 %s1121_s6, 4  ;;  %s51_s10 = int_to_ptr.vmem [resolvable:$true] %s50_s10  ;;  %s77_s13 = int_to_ptr.hbm [resolvable:$true] %s76_s13 }
  0x10   :  { %53 = dma.hbm_to_vmem [thread:$0]  %s49_s29, 64, %s51_s10, [#allocation6]  }
  0x11   :  { %s958_s0 = smov [#allocation10]  }
  0x12   :  { %s78_s14 = sshll.u32 %s958_s0, 4  ;;  %s79_s14 = int_to_ptr.vmem [resolvable:$true] %s78_s14 }
  0x13   :  { %81 = dma.hbm_to_vmem [thread:$0]  %s77_s13, 32, %s79_s14, [#allocation9]  }
  0x14   :  { %944 = dma.done.wait [#allocation4], 128  }
  0x15   :  { %945 = vsyncadd [#allocation4], 4294967168 }
  0x16   :  { %946 = dma.done.wait [#allocation6], 1088  }
  0x17   :  { %947 = vsyncadd [#allocation6], 4294966208 }
  0x18   :  { %948 = dma.done.wait [#allocation9], 16416  }
  0x19   :  { %949 = vsyncadd [#allocation9], 4294950880  ;;  %vm119_vm0 = vcmask 1043456   ;;  %v111_v1 = vld [vmem:[#allocation5 + $0x20] sm:$0xf]  ;;  %v108_v6 = vld [vmem:[#allocation5 + $0x8] sm:$0xff] }
  0x1a   :  { %v112_v2 = vld [vmem:[#allocation5 + $0x28] sm:$0xf]  ;;  %v113_v3 = vld [vmem:[#allocation5 + $0x30] sm:$0xf]  ;;  %789 = vmatpush.msk.msra.mxu0 %vm119_vm0, %v111_v1  ;;  %v114_v4 = vld [vmem:[#allocation5 + $0x38] sm:$0xf] }
  0x1b   :  { %791 = vmatpush.msk.msra.mxu1 %vm119_vm0, %v112_v2  ;;  %v107_v5 = vld [vmem:[#allocation5] sm:$0xff]  ;;  %793 = vmatpush.msk.msra.mxu2 %vm119_vm0, %v113_v3  ;;  %v109_v7 = vld [vmem:[#allocation5 + $0x10] sm:$0xff]  ;;  %v110_v8 = vld [vmem:[#allocation5 + $0x18] sm:$0xff]  ;;  %vm115_vm1 = vcmask 97280   ;;  %vm328_vm12 = vcmask 1040384   ;;  %vm330_vm14 = vcmask 1042434  }
  0x1c   :  { %795 = vmatpush.msk.msra.mxu3 %vm119_vm0, %v114_v4  ;;  %v106_v9 = vld [vmem:[#allocation3] sm:$0xff]  ;;  %147 = vmatpush.msra.mxu0 %v107_v5  ;;  %v403_v14 = vld [vmem:[#allocation8 + $0xe0] sm:$0xff]  ;;  %vm332_vm0 = vcmask 1041408  }
  0x1d   :  { %167 = vmatpush.msra.mxu1 %v108_v6  ;;  %187 = vmatpush.msra.mxu2 %v109_v7  ;;  %v405_v10 = vld [vmem:[#allocation8 + $0xf0] sm:$0xff]  ;;  %v435_v15 = vld [vmem:[#allocation8 + $0x1e0] sm:$0xff] }
  0x1e   :  { %207 = vmatpush.msra.mxu3 %v110_v8  ;;  %790 = vmatmul.msk.f32.vlgmr.msra.gmra.mxu0 %vm115_vm1, %v106_v9  ;;  %v437_v11 = vld [vmem:[#allocation8 + $0x1f0] sm:$0xff]  ;;  %v467_v16 = vld [vmem:[#allocation8 + $0x2e0] sm:$0xff] }
  0x1f   :  { %792 = vmatmul.msk.f32.vlgmr.msra.gmra.mxu1 %vm115_vm1, %v106_v9  ;;  %794 = vmatmul.msk.f32.vlgmr.msra.gmra.mxu2 %vm115_vm1, %v106_v9  ;;  %v469_v12 = vld [vmem:[#allocation8 + $0x2f0] sm:$0xff]  ;;  %v499_v17 = vld [vmem:[#allocation8 + $0x3e0] sm:$0xff] }
  0x20   :  { %796 = vmatmul.msk.f32.vlgmr.msra.gmra.mxu3 %vm115_vm1, %v106_v9  ;;  %503 = vmatpush.msrb.mxu0 %v405_v10  ;;  %v501_v13 = vld [vmem:[#allocation8 + $0x3f0] sm:$0xff]  ;;  %v399_v22 = vld [vmem:[#allocation8 + $0xc0] sm:$0xff] }
  0x21   :  { %523 = vmatpush.msrb.mxu1 %v437_v11  ;;  %543 = vmatpush.msrb.mxu2 %v469_v12  ;;  %v401_v18 = vld [vmem:[#allocation8 + $0xd0] sm:$0xff]  ;;  %v431_v23 = vld [vmem:[#allocation8 + $0x1c0] sm:$0xff] }
  0x22   :  { %563 = vmatpush.msrb.mxu3 %v501_v13  ;;  %504 = vmatpush.msrb.mxu0 %v403_v14  ;;  %v433_v19 = vld [vmem:[#allocation8 + $0x1d0] sm:$0xff]  ;;  %v463_v24 = vld [vmem:[#allocation8 + $0x2c0] sm:$0xff] }
  0x23   :  { %524 = vmatpush.msrb.mxu1 %v435_v15  ;;  %544 = vmatpush.msrb.mxu2 %v467_v16  ;;  %v465_v20 = vld [vmem:[#allocation8 + $0x2d0] sm:$0xff]  ;;  %v495_v25 = vld [vmem:[#allocation8 + $0x3c0] sm:$0xff] }
  0x24   :  { %564 = vmatpush.msrb.mxu3 %v499_v17  ;;  %505 = vmatpush.msrb.mxu0 %v401_v18  ;;  %v497_v21 = vld [vmem:[#allocation8 + $0x3d0] sm:$0xff]  ;;  %v395_v30 = vld [vmem:[#allocation8 + $0xa0] sm:$0xff] }
  0x25   :  { %525 = vmatpush.msrb.mxu1 %v433_v19  ;;  %545 = vmatpush.msrb.mxu2 %v465_v20  ;;  %v397_v26 = vld [vmem:[#allocation8 + $0xb0] sm:$0xff]  ;;  %v427_v31 = vld [vmem:[#allocation8 + $0x1a0] sm:$0xff] }
  0x26   :  { %565 = vmatpush.msrb.mxu3 %v497_v21  ;;  %506 = vmatpush.msrb.mxu0 %v399_v22  ;;  %v429_v27 = vld [vmem:[#allocation8 + $0x1b0] sm:$0xff]  ;;  %v459_v32 = vld [vmem:[#allocation8 + $0x2a0] sm:$0xff] }
  0x27   :  { %526 = vmatpush.msrb.mxu1 %v431_v23  ;;  %546 = vmatpush.msrb.mxu2 %v463_v24  ;;  %v461_v28 = vld [vmem:[#allocation8 + $0x2b0] sm:$0xff]  ;;  %v491_v35 = vld [vmem:[#allocation8 + $0x3a0] sm:$0xff] }
  0x28   :  { %566 = vmatpush.msrb.mxu3 %v495_v25  ;;  %507 = vmatpush.msrb.mxu0 %v397_v26  ;;  %v493_v29 = vld [vmem:[#allocation8 + $0x3b0] sm:$0xff]  ;;  %v391_v44 = vld [vmem:[#allocation8 + $0x80] sm:$0xff] }
  0x29   :  { %527 = vmatpush.msrb.mxu1 %v429_v27  ;;  %547 = vmatpush.msrb.mxu2 %v461_v28  ;;  %v393_v38 = vld [vmem:[#allocation8 + $0x90] sm:$0xff]  ;;  %v423_v45 = vld [vmem:[#allocation8 + $0x180] sm:$0xff] }
  0x2a   :  { %567 = vmatpush.msrb.mxu3 %v493_v29  ;;  %508 = vmatpush.msrb.mxu0 %v395_v30  ;;  %v425_v39 = vld [vmem:[#allocation8 + $0x190] sm:$0xff]  ;;  %v455_v46 = vld [vmem:[#allocation8 + $0x280] sm:$0xff] }
  0x2b   :  { %528 = vmatpush.msrb.mxu1 %v427_v31  ;;  %548 = vmatpush.msrb.mxu2 %v459_v32  ;;  %v457_v40 = vld [vmem:[#allocation8 + $0x290] sm:$0xff]  ;;  %v487_v47 = vld [vmem:[#allocation8 + $0x380] sm:$0xff] }
  0x2c   :  { %568 = vmatpush.msrb.mxu3 %v491_v35  ;;  %509 = vmatpush.msrb.mxu0 %v393_v38  ;;  %v489_v41 = vld [vmem:[#allocation8 + $0x390] sm:$0xff]  ;;  %v387_v58 = vld [vmem:[#allocation8 + $0x60] sm:$0xff] }
  0x2d   :  { %529 = vmatpush.msrb.mxu1 %v425_v39  ;;  %549 = vmatpush.msrb.mxu2 %v457_v40  ;;  %v389_v50 = vld [vmem:[#allocation8 + $0x70] sm:$0xff]  ;;  %v419_v59 = vld [vmem:[#allocation8 + $0x160] sm:$0xff] }
  0x2e   :  { %569 = vmatpush.msrb.mxu3 %v489_v41  ;;  %510 = vmatpush.msrb.mxu0 %v391_v44  ;;  %v421_v51 = vld [vmem:[#allocation8 + $0x170] sm:$0xff]  ;;  %v451_v60 = vld [vmem:[#allocation8 + $0x260] sm:$0xff] }
  0x2f   :  { %530 = vmatpush.msrb.mxu1 %v423_v45  ;;  %550 = vmatpush.msrb.mxu2 %v455_v46  ;;  %v453_v52 = vld [vmem:[#allocation8 + $0x270] sm:$0xff]  ;;  %v483_v63 = vld [vmem:[#allocation8 + $0x360] sm:$0xff] }
  0x30   :  { %570 = vmatpush.msrb.mxu3 %v487_v47  ;;  %511 = vmatpush.msrb.mxu0 %v389_v50  ;;  %v485_v53 = vld [vmem:[#allocation8 + $0x370] sm:$0xff]  ;;  %v383_v10 = vld [vmem:[#allocation8 + $0x40] sm:$0xff] }
  0x31   :  { %531 = vmatpush.msrb.mxu1 %v421_v51  ;;  %551 = vmatpush.msrb.mxu2 %v453_v52  ;;  %v385_v2 = vld [vmem:[#allocation8 + $0x50] sm:$0xff]  ;;  %v415_v11 = vld [vmem:[#allocation8 + $0x140] sm:$0xff]  ;;  %v470_v52 = vld [vmem:[#allocation8 + $0x2f8] sm:$0xff] }
  0x32   :  { %571 = vmatpush.msrb.mxu3 %v485_v53  ;;  %512 = vmatpush.msrb.mxu0 %v387_v58  ;;  %v417_v3 = vld [vmem:[#allocation8 + $0x150] sm:$0xff]  ;;  %v447_v12 = vld [vmem:[#allocation8 + $0x240] sm:$0xff]  ;;  %v502_v53 = vld [vmem:[#allocation8 + $0x3f8] sm:$0xff] }
  0x33   :  { %532 = vmatpush.msrb.mxu1 %v419_v59  ;;  %552 = vmatpush.msrb.mxu2 %v451_v60  ;;  %v449_v4 = vld [vmem:[#allocation8 + $0x250] sm:$0xff]  ;;  %v479_v15 = vld [vmem:[#allocation8 + $0x340] sm:$0xff]  ;;  %v404_v58 = vld [vmem:[#allocation8 + $0xe8] sm:$0xff] }
  0x34   :  { %572 = vmatpush.msrb.mxu3 %v483_v63  ;;  %513 = vmatpush.msrb.mxu0 %v385_v2  ;;  %v481_v7 = vld [vmem:[#allocation8 + $0x350] sm:$0xff]  ;;  %v379_v26 = vld [vmem:[#allocation8 + $0x20] sm:$0xff]  ;;  %v436_v59 = vld [vmem:[#allocation8 + $0x1e8] sm:$0xff] }
  0x35   :  { %533 = vmatpush.msrb.mxu1 %v417_v3  ;;  %553 = vmatpush.msrb.mxu2 %v449_v4  ;;  %v381_v18 = vld [vmem:[#allocation8 + $0x30] sm:$0xff]  ;;  %v411_v27 = vld [vmem:[#allocation8 + $0x120] sm:$0xff]  ;;  %v468_v60 = vld [vmem:[#allocation8 + $0x2e8] sm:$0xff] }
  0x36   :  { %573 = vmatpush.msrb.mxu3 %v481_v7  ;;  %514 = vmatpush.msrb.mxu0 %v383_v10  ;;  %v413_v19 = vld [vmem:[#allocation8 + $0x130] sm:$0xff]  ;;  %v443_v28 = vld [vmem:[#allocation8 + $0x220] sm:$0xff]  ;;  %v500_v63 = vld [vmem:[#allocation8 + $0x3e8] sm:$0xff] }
  0x37   :  { %534 = vmatpush.msrb.mxu1 %v415_v11  ;;  %554 = vmatpush.msrb.mxu2 %v447_v12  ;;  %v445_v20 = vld [vmem:[#allocation8 + $0x230] sm:$0xff]  ;;  %v475_v31 = vld [vmem:[#allocation8 + $0x320] sm:$0xff]  ;;  %v466_v2 = vld [vmem:[#allocation8 + $0x2d8] sm:$0xff] }
  0x38   :  { %574 = vmatpush.msrb.mxu3 %v479_v15  ;;  %515 = vmatpush.msrb.mxu0 %v381_v18  ;;  %v477_v23 = vld [vmem:[#allocation8 + $0x330] sm:$0xff]  ;;  %v439_v44 = vld [vmem:[#allocation8 + $0x200] sm:$0xff]  ;;  %v464_v10 = vld [vmem:[#allocation8 + $0x2c8] sm:$0xff] }
  0x39   :  { %535 = vmatpush.msrb.mxu1 %v413_v19  ;;  %555 = vmatpush.msrb.mxu2 %v445_v20  ;;  %v409_v35 = vld [vmem:[#allocation8 + $0x110] sm:$0xff]  ;;  %v471_v47 = vld [vmem:[#allocation8 + $0x300] sm:$0xff]  ;;  %v462_v20 = vld [vmem:[#allocation8 + $0x2b8] sm:$0xff] }
  0x3a   :  { %575 = vmatpush.msrb.mxu3 %v477_v23  ;;  %516 = vmatpush.msrb.mxu0 %v379_v26  ;;  %v473_v39 = vld [vmem:[#allocation8 + $0x310] sm:$0xff]  ;;  %v396_v26 = vld [vmem:[#allocation8 + $0xa8] sm:$0xff] }
  0x3b   :  { %536 = vmatpush.msrb.mxu1 %v411_v27  ;;  %556 = vmatpush.msrb.mxu2 %v443_v28  ;;  %v428_v27 = vld [vmem:[#allocation8 + $0x1a8] sm:$0xff] }
  0x3c   :  { %576 = vmatpush.msrb.mxu3 %v475_v31  ;;  %v460_v28 = vld [vmem:[#allocation8 + $0x2a8] sm:$0xff] }
  0x3d   :  { %537 = vmatpush.msrb.mxu1 %v409_v35  ;;  %v492_v31 = vld [vmem:[#allocation8 + $0x3a8] sm:$0xff]  ;;  %v426_v35 = vld [vmem:[#allocation8 + $0x198] sm:$0xff] }
  0x3e   :  { %577 = vmatpush.msrb.mxu3 %v473_v39  ;;  %v490_v39 = vld [vmem:[#allocation8 + $0x398] sm:$0xff] }
  0x40   :  { %578 = vmatpush.msrb.mxu3 %v471_v47 }
  0x42   :  { %643 = vmatpush.msra.mxu3 %v502_v53  ;;  %v420_v53 = vld [vmem:[#allocation8 + $0x168] sm:$0xff] }
  0x44   :  { %644 = vmatpush.msra.mxu3 %v500_v63  ;;  %v418_v63 = vld [vmem:[#allocation8 + $0x158] sm:$0xff] }
  0x9b   :  { %v1027_v33 = vpop.f32.mrf.mxu0 }
  0x9c   :  { %v1029_v34 = vpop.f32.mrf.mxu1  ;;  %v212_v36 = vrot.slane %v1027_v33, 4 }
  0x9d   :  { %v218_v37 = vrot.slane %v1029_v34, 4 }
  0x9e   :  { %v213_v42 = vadd.f32 %v212_v36, %v1027_v33  ;;  %v441_v36 = vld [vmem:[#allocation8 + $0x210] sm:$0xff] }
  0x9f   :  { %v219_v43 = vadd.f32 %v218_v37, %v1029_v34  ;;  %557 = vmatpush.msrb.mxu2 %v441_v36  ;;  %v458_v36 = vld [vmem:[#allocation8 + $0x298] sm:$0xff] }
  0xa0   :  { %v214_v48 = vrot.slane %v213_v42, 2 }
  0xa1   :  { %v220_v49 = vrot.slane %v219_v43, 2  ;;  %558 = vmatpush.msrb.mxu2 %v439_v44  ;;  %v456_v44 = vld [vmem:[#allocation8 + $0x288] sm:$0xff] }
  0xa2   :  { %v215_v54 = vadd.f32 %v214_v48, %v213_v42  ;;  %v1035_v56 = vpop.f32.mrf.mxu2  ;;  %v375_v42 = vld [vmem:[#allocation8] sm:$0xff]  ;;  %v406_v48 = vld [vmem:[#allocation8 + $0xf8] sm:$0xff] }
  0xa3   :  { %v221_v55 = vadd.f32 %v220_v49, %v219_v43  ;;  %v1037_v57 = vpop.f32.mrf.mxu3  ;;  %v224_v61 = vrot.slane %v1035_v56, 4  ;;  %v407_v43 = vld [vmem:[#allocation8 + $0x100] sm:$0xff]  ;;  %v438_v49 = vld [vmem:[#allocation8 + $0x1f8] sm:$0xff]  ;;  %623 = vmatpush.msra.mxu2 %v470_v52  ;;  %v388_v52 = vld [vmem:[#allocation8 + $0x68] sm:$0xff] }
  0xa4   :  { %v230_v62 = vrot.slane %v1037_v57, 4  ;;  %v216_v0 = vrot.slane %v215_v54, 1  ;;  %538 = vmatpush.msrb.mxu1 %v407_v43  ;;  %v424_v43 = vld [vmem:[#allocation8 + $0x188] sm:$0xff] }
  0xa5   :  { %v222_v1 = vrot.slane %v221_v55, 1  ;;  %v225_v5 = vadd.f32 %v224_v61, %v1035_v56  ;;  %624 = vmatpush.msra.mxu2 %v468_v60  ;;  %v452_v60 = vld [vmem:[#allocation8 + $0x268] sm:$0xff] }
  0xa6   :  { %v231_v6 = vadd.f32 %v230_v62, %v1037_v57  ;;  %v217_v8 = vadd.f32 %v216_v0, %v215_v54  ;;  %603 = vmatpush.msra.mxu1 %v438_v49  ;;  %v422_v49 = vld [vmem:[#allocation8 + $0x178] sm:$0xff] }
  0xa7   :  { %v223_v9 = vadd.f32 %v222_v1, %v221_v55  ;;  %v226_v13 = vrot.slane %v225_v5, 2  ;;  %v434_v1 = vld [vmem:[#allocation8 + $0x1d8] sm:$0xff]  ;;  %625 = vmatpush.msra.mxu2 %v466_v2 }
  0xa8   :  { %v232_v14 = vrot.slane %v231_v6, 2  ;;  %v236_v16 = vmul.f32 0.125, %v217_v8  ;;  %604 = vmatpush.msra.mxu1 %v436_v59  ;;  %v400_v8 = vld [vmem:[#allocation8 + $0xc8] sm:$0xff] }
  0xa9   :  { %v237_v17 = vmul.f32 0.125, %v223_v9  ;;  %v227_v21 = vadd.f32 %v226_v13, %v225_v5  ;;  %v498_v5 = vld [vmem:[#allocation8 + $0x3d8] sm:$0xff]  ;;  %v432_v9 = vld [vmem:[#allocation8 + $0x1c8] sm:$0xff]  ;;  %626 = vmatpush.msra.mxu2 %v464_v10 }
  0xaa   :  { %v233_v22 = vadd.f32 %v232_v14, %v231_v6  ;;  %v1044_v24 = vsub.f32 %v1027_v33, %v236_v16  ;;  %605 = vmatpush.msra.mxu1 %v434_v1  ;;  %645 = vmatpush.msra.mxu3 %v498_v5  ;;  %v496_v13 = vld [vmem:[#allocation8 + $0x3c8] sm:$0xff]  ;;  %v398_v16 = vld [vmem:[#allocation8 + $0xb8] sm:$0xff] }
  0xab   :  { %v1047_v25 = vsub.f32 %v1029_v34, %v237_v17  ;;  %v228_v29 = vrot.slane %v227_v21, 1  ;;  %v377_v34 = vld [vmem:[#allocation8 + $0x10] sm:$0xff]  ;;  %v430_v17 = vld [vmem:[#allocation8 + $0x1b8] sm:$0xff]  ;;  %627 = vmatpush.msra.mxu2 %v462_v20  ;;  %v476_v20 = vld [vmem:[#allocation8 + $0x328] sm:$0xff] }
  0xac   :  { %v234_v30 = vrot.slane %v233_v22, 1  ;;  %v244_v32 = vmul.f32 %v1044_v24, %v1044_v24  ;;  %517 = vmatpush.msrb.mxu0 %v377_v34  ;;  %606 = vmatpush.msra.mxu1 %v432_v9  ;;  %v394_v34 = vld [vmem:[#allocation8 + $0x98] sm:$0xff] }
  0xad   :  { %v245_v33 = vmul.f32 %v1047_v25, %v1047_v25  ;;  %v229_v37 = vadd.f32 %v228_v29, %v227_v21  ;;  %646 = vmatpush.msra.mxu3 %v496_v13  ;;  %v494_v21 = vld [vmem:[#allocation8 + $0x3b8] sm:$0xff]  ;;  %628 = vmatpush.msra.mxu2 %v460_v28 }
  0xae   :  { %v235_v38 = vadd.f32 %v234_v30, %v233_v22  ;;  %v248_v40 = vrot.slane %v244_v32, 4  ;;  %518 = vmatpush.msrb.mxu0 %v375_v42  ;;  %607 = vmatpush.msra.mxu1 %v430_v17  ;;  %v392_v42 = vld [vmem:[#allocation8 + $0x88] sm:$0xff]  ;;  %v482_v1 = vld [vmem:[#allocation8 + $0x358] sm:$0xff] }
  0xaf   :  { %v254_v41 = vrot.slane %v245_v33, 4  ;;  %v238_v45 = vmul.f32 0.125, %v229_v37  ;;  %647 = vmatpush.msra.mxu3 %v494_v21  ;;  %629 = vmatpush.msra.mxu2 %v458_v36  ;;  %v446_v13 = vld [vmem:[#allocation8 + $0x238] sm:$0xff]  ;;  %v412_v17 = vld [vmem:[#allocation8 + $0x128] sm:$0xff] }
  0xb0   :  { %v239_v46 = vmul.f32 0.125, %v235_v38  ;;  %v249_v50 = vadd.f32 %v248_v40, %v244_v32  ;;  %583 = vmatpush.msra.mxu0 %v406_v48  ;;  %608 = vmatpush.msra.mxu1 %v428_v27  ;;  %v390_v48 = vld [vmem:[#allocation8 + $0x78] sm:$0xff]  ;;  %v472_v36 = vld [vmem:[#allocation8 + $0x308] sm:$0xff] }
  0xb1   :  { %v255_v51 = vadd.f32 %v254_v41, %v245_v33  ;;  %v1054_v54 = vsub.f32 %v1035_v56, %v238_v45  ;;  %648 = vmatpush.msra.mxu3 %v492_v31  ;;  %v488_v45 = vld [vmem:[#allocation8 + $0x388] sm:$0xff]  ;;  %630 = vmatpush.msra.mxu2 %v456_v44  ;;  %v378_v21 = vld [vmem:[#allocation8 + $0x18] sm:$0xff] }
  0xb2   :  { %v1057_v55 = vsub.f32 %v1037_v57, %v239_v46  ;;  %v250_v61 = vrot.slane %v249_v50, 2  ;;  %584 = vmatpush.msra.mxu0 %v404_v58  ;;  %v402_v57 = vld [vmem:[#allocation8 + $0xd8] sm:$0xff]  ;;  %609 = vmatpush.msra.mxu1 %v426_v35  ;;  %v376_v31 = vld [vmem:[#allocation8 + $0x8] sm:$0xff] }
  0xb3   :  { %v256_v62 = vrot.slane %v255_v51, 2  ;;  %v246_v0 = vmul.f32 %v1054_v54, %v1054_v54  ;;  %649 = vmatpush.msra.mxu3 %v490_v39  ;;  %v474_v27 = vld [vmem:[#allocation8 + $0x318] sm:$0xff]  ;;  %v440_v35 = vld [vmem:[#allocation8 + $0x208] sm:$0xff] }
  0xb4   :  { %v247_v56 = vmul.f32 %v1057_v55, %v1057_v55  ;;  %v251_v3 = vadd.f32 %v250_v61, %v249_v50  ;;  %585 = vmatpush.msra.mxu0 %v402_v57  ;;  %610 = vmatpush.msra.mxu1 %v424_v43  ;;  %v454_v50 = vld [vmem:[#allocation8 + $0x278] sm:$0xff]  ;;  %v484_v61 = vld [vmem:[#allocation8 + $0x368] sm:$0xff] }
  0xb5   :  { %v257_v4 = vadd.f32 %v256_v62, %v255_v51  ;;  %v260_v6 = vrot.slane %v246_v0, 4  ;;  %650 = vmatpush.msra.mxu3 %v488_v45  ;;  %v486_v51 = vld [vmem:[#allocation8 + $0x378] sm:$0xff]  ;;  %631 = vmatpush.msra.mxu2 %v454_v50 }
  0xb6   :  { %v266_v7 = vrot.slane %v247_v56, 4  ;;  %v252_v11 = vrot.slane %v251_v3, 1  ;;  %586 = vmatpush.msra.mxu0 %v400_v8  ;;  %611 = vmatpush.msra.mxu1 %v422_v49  ;;  %v386_v62 = vld [vmem:[#allocation8 + $0x58] sm:$0xff]  ;;  %v480_v8 = vld [vmem:[#allocation8 + $0x348] sm:$0xff] }
  0xb7   :  { %v258_v12 = vrot.slane %v257_v4, 1  ;;  %v261_v14 = vadd.f32 %v260_v6, %v246_v0  ;;  %651 = vmatpush.msra.mxu3 %v486_v51  ;;  %v450_v57 = vld [vmem:[#allocation8 + $0x258] sm:$0xff]  ;;  %632 = vmatpush.msra.mxu2 %v452_v60 }
  0xb8   :  { %v267_v15 = vadd.f32 %v266_v7, %v247_v56  ;;  %v253_v18 = vadd.f32 %v252_v11, %v251_v3  ;;  %587 = vmatpush.msra.mxu0 %v398_v16  ;;  %612 = vmatpush.msra.mxu1 %v420_v53  ;;  %v384_v3 = vld [vmem:[#allocation8 + $0x48] sm:$0xff]  ;;  %v382_v11 = vld [vmem:[#allocation8 + $0x38] sm:$0xff] }
  0xb9   :  { %v259_v19 = vadd.f32 %v258_v12, %v257_v4  ;;  %v262_v22 = vrot.slane %v261_v14, 2  ;;  %652 = vmatpush.msra.mxu3 %v484_v61  ;;  %v416_v4 = vld [vmem:[#allocation8 + $0x148] sm:$0xff]  ;;  %633 = vmatpush.msra.mxu2 %v450_v57  ;;  %v414_v12 = vld [vmem:[#allocation8 + $0x138] sm:$0xff] }
  0xba   :  { %v268_v23 = vrot.slane %v267_v15, 2  ;;  %v272_v29 = vmul.f32 0.125, %v253_v18  ;;  %588 = vmatpush.msra.mxu0 %v396_v26  ;;  %613 = vmatpush.msra.mxu1 %v418_v63  ;;  %v448_v7 = vld [vmem:[#allocation8 + $0x248] sm:$0xff]  ;;  %v442_v26 = vld [vmem:[#allocation8 + $0x218] sm:$0xff]  ;;  %v349_v63 = vld [vmem:[%s1118_s3] sm:$0xf] }
  0xbb   :  { %v273_v30 = vmul.f32 0.125, %v259_v19  ;;  %v263_v32 = vadd.f32 %v262_v22, %v261_v14  ;;  %653 = vmatpush.msra.mxu3 %v482_v1  ;;  %634 = vmatpush.msra.mxu2 %v448_v7  ;;  %v380_v16 = vld [vmem:[#allocation8 + $0x28] sm:$0xff]  ;;  %v276_v60 = vld [vmem:[#allocation7] sm:$0xf]  ;;  %v351_v57 = vperm.slane %v349_v63, 0  ;;  %v353_v1 = vperm.slane %v349_v63, 2 }
  0xbc   :  { %v269_v33 = vadd.f32 %v268_v23, %v267_v15  ;;  %v1063_v37 = vadd.f32 1e-05, %v272_v29  ;;  %589 = vmatpush.msra.mxu0 %v394_v34  ;;  %614 = vmatpush.msra.mxu1 %v416_v4  ;;  %v478_v15 = vld [vmem:[#allocation8 + $0x338] sm:$0xff]  ;;  %v444_v19 = vld [vmem:[#allocation8 + $0x228] sm:$0xff] }
  0xbd   :  { %v1065_v38 = vadd.f32 1e-05, %v273_v30  ;;  %v264_v40 = vrot.slane %v263_v32, 1  ;;  %654 = vmatpush.msra.mxu3 %v480_v8  ;;  %635 = vmatpush.msra.mxu2 %v446_v13  ;;  %v410_v23 = vld [vmem:[#allocation8 + $0x118] sm:$0xff] }
  0xbe   :  { %v270_v41 = vrot.slane %v269_v33, 1  ;;  %808 = vrsqrt.f32 %v1063_v37  ;;  %590 = vmatpush.msra.mxu0 %v392_v42  ;;  %615 = vmatpush.msra.mxu1 %v414_v12  ;;  %vm287_vm13 = vweird.f32 %v1063_v37 }
  0xbf   :  { %810 = vrsqrt.f32 %v1065_v38  ;;  %v265_v46 = vadd.f32 %v264_v40, %v263_v32  ;;  %655 = vmatpush.msra.mxu3 %v478_v15  ;;  %636 = vmatpush.msra.mxu2 %v444_v19  ;;  %v408_v32 = vld [vmem:[#allocation8 + $0x108] sm:$0xff]  ;;  %vm297_vm3 = vweird.f32 %v1065_v38 }
  0xc0   :  { %v271_v47 = vadd.f32 %v270_v41, %v269_v33  ;;  %591 = vmatpush.msra.mxu0 %v390_v48  ;;  %616 = vmatpush.msra.mxu1 %v412_v17 }
  0xc1   :  { %v274_v58 = vmul.f32 0.125, %v265_v46  ;;  %656 = vmatpush.msra.mxu3 %v476_v20  ;;  %637 = vmatpush.msra.mxu2 %v442_v26 }
  0xc2   :  { %v275_v59 = vmul.f32 0.125, %v271_v47  ;;  %592 = vmatpush.msra.mxu0 %v388_v52  ;;  %617 = vmatpush.msra.mxu1 %v410_v23 }
  0xc3   :  { %v1069_v0 = vadd.f32 1e-05, %v274_v58  ;;  %657 = vmatpush.msra.mxu3 %v474_v27  ;;  %638 = vmatpush.msra.mxu2 %v440_v35 }
  0xc4   :  { %v1071_v56 = vadd.f32 1e-05, %v275_v59  ;;  %v1073_v2 = vpop.eup %808  ;;  %593 = vmatpush.msra.mxu0 %v386_v62  ;;  %618 = vmatpush.msra.mxu1 %v408_v32 }
  0xc5   :  { %v1075_v5 = vpop.eup %810  ;;  %v282_v6 = vmul.f32 %v1073_v2, %v1063_v37  ;;  %812 = vrsqrt.f32 %v1069_v0  ;;  %658 = vmatpush.msra.mxu3 %v472_v36  ;;  %vm307_vm7 = vweird.f32 %v1069_v0  ;;  %vm288_vm8 = vweird.f32 %v1073_v2 }
  0xc6   :  { %v292_v9 = vmul.f32 %v1075_v5, %v1065_v38  ;;  %814 = vrsqrt.f32 %v1071_v56  ;;  %594 = vmatpush.msra.mxu0 %v384_v3  ;;  %vm298_vm2 = vweird.f32 %v1075_v5  ;;  %vm317_vm10 = vweird.f32 %v1071_v56  ;;  %vm289_vm15 = vmor %vm287_vm13, %vm288_vm8 }
  0xc7   :  { %v283_v14 = vmul.f32 %v1073_v2, %v282_v6  ;;  %vm299_vm4 = vmor %vm297_vm3, %vm298_vm2  ;;  %v352_v37 = vperm.slane %v349_v63, 1  ;;  %v354_v3 = vperm.slane %v349_v63, 3 }
  0xc8   :  { %v293_v10 = vmul.f32 %v1075_v5, %v292_v9  ;;  %595 = vmatpush.msra.mxu0 %v382_v11 }
  0xc9   :  { %v284_v33 = vmul.f32 0.5, %v283_v14 }
  0xca   :  { %v294_v18 = vmul.f32 0.5, %v293_v10  ;;  %596 = vmatpush.msra.mxu0 %v380_v16 }
  0xcb   :  { %v813_v22 = vpop.eup %812  ;;  %v285_v43 = vsub.f32 1.5, %v284_v33 }
  0xcc   :  { %v815_v28 = vpop.eup %814  ;;  %v295_v29 = vsub.f32 1.5, %v294_v18  ;;  %v302_v30 = vmul.f32 %v813_v22, %v1069_v0  ;;  %597 = vmatpush.msra.mxu0 %v378_v21  ;;  %vm308_vm5 = vweird.f32 %v813_v22 }
  0xcd   :  { %v312_v34 = vmul.f32 %v815_v28, %v1071_v56  ;;  %vm318_vm6 = vweird.f32 %v815_v28  ;;  %v286_v49 = vmul.f32 %v1073_v2, %v285_v43  ;;  %vm309_vm9 = vmor %vm307_vm7, %vm308_vm5 }
  0xce   :  { %v303_v39 = vmul.f32 %v813_v22, %v302_v30  ;;  %v296_v40 = vmul.f32 %v1075_v5, %v295_v29  ;;  %598 = vmatpush.msra.mxu0 %v376_v31  ;;  %vm319_vm11 = vmor %vm317_vm10, %vm318_vm6 }
  0xcf   :  { %v313_v41 = vmul.f32 %v815_v28, %v312_v34  ;;  %v290_v59 = vsel %vm289_vm15, %v1073_v2, %v286_v49 }
  0xd0   :  { %v304_v42 = vmul.f32 0.5, %v303_v39  ;;  %v300_v46 = vsel %vm299_vm4, %v1075_v5, %v296_v40 }
  0xd1   :  { %v314_v44 = vmul.f32 0.5, %v313_v41  ;;  %v325_v38 = vrot.slane %v300_v46, 7 }
  0xd2   :  { %v305_v45 = vsub.f32 1.5, %v304_v42 }
  0xd3   :  { %v315_v47 = vsub.f32 1.5, %v314_v44  ;;  %v329_v61 = vsel %vm328_vm12, %v290_v59, %v325_v38 }
  0xd4   :  { %v306_v48 = vmul.f32 %v813_v22, %v305_v45 }
  0xd5   :  { %v316_v50 = vmul.f32 %v815_v28, %v315_v47 }
  0xd6   :  { %v310_v51 = vsel %vm309_vm9, %v813_v22, %v306_v48 }
  0xd7   :  { %v326_v52 = vrot.slane %v310_v51, 6  ;;  %v320_v53 = vsel %vm319_vm11, %v815_v28, %v316_v50 }
  0xd8   :  { %v327_v58 = vrot.slane %v320_v53, 5 }
  0xda   :  { %v331_v62 = vsel %vm330_vm14, %v326_v52, %v327_v58 }
  0xdb   :  { %v333_v0 = vsel %vm332_vm0, %v329_v61, %v331_v62  ;;  %vm780_vm0 = vcmask 7168  }
  0xdc   :  { %v335_v56 = vmul.f32 %v333_v0, %v276_v60 }
  0xde   :  { %v340_v4 = vperm.slane %v335_v56, 3  ;;  %v337_v5 = vperm.slane %v335_v56, 0  ;;  %v338_v6 = vperm.slane %v335_v56, 1  ;;  %v339_v7 = vperm.slane %v335_v56, 2 }
  0xe0   :  { %v348_v2 = vmul.f32 %v340_v4, %v1057_v55  ;;  %v345_v8 = vmul.f32 %v337_v5, %v1044_v24  ;;  %v346_v9 = vmul.f32 %v338_v6, %v1047_v25  ;;  %v347_v10 = vmul.f32 %v339_v7, %v1054_v54 }
  0xe2   :  { %v359_v11 = vadd.f32 %v351_v57, %v345_v8  ;;  %v360_v12 = vadd.f32 %v352_v37, %v346_v9  ;;  %v361_v13 = vadd.f32 %v353_v1, %v347_v10  ;;  %v362_v14 = vadd.f32 %v354_v3, %v348_v2 }
  0xe4   :  { %vm363_vm1 = vcmp.ge.f32.partialorder %v359_v11, 0.0  ;;  %v367_v15 = vmul.f32 0.01, %v359_v11  ;;  %vm364_vm2 = vcmp.ge.f32.partialorder %v360_v12, 0.0  ;;  %v368_v16 = vmul.f32 0.01, %v360_v12 }
  0xe5   :  { %vm365_vm3 = vcmp.ge.f32.partialorder %v361_v13, 0.0  ;;  %v369_v17 = vmul.f32 0.01, %v361_v13  ;;  %vm366_vm4 = vcmp.ge.f32.partialorder %v362_v14, 0.0  ;;  %v370_v18 = vmul.f32 0.01, %v362_v14 }
  0xe6   :  { %v371_v19 = vsel %vm363_vm1, %v359_v11, %v367_v15  ;;  %v372_v55 = vsel %vm364_vm2, %v360_v12, %v368_v16 }
  0xe7   :  { %519 = vmatmul.f32.vlgmr.msrb.gmra.mxu0 %v371_v19  ;;  %539 = vmatmul.f32.vlgmr.msrb.gmra.mxu1 %v372_v55  ;;  %v373_v24 = vsel %vm365_vm3, %v361_v13, %v369_v17  ;;  %v374_v25 = vsel %vm366_vm4, %v362_v14, %v370_v18 }
  0xe8   :  { %559 = vmatmul.f32.vlgmr.msrb.gmra.mxu2 %v373_v24  ;;  %579 = vmatmul.f32.vlgmr.msrb.gmra.mxu3 %v374_v25 }
  0xef   :  { %599 = vmatmul.f32.vlgmr.msra.gmra.mxu0 %v371_v19  ;;  %619 = vmatmul.f32.vlgmr.msra.gmra.mxu1 %v372_v55  ;;  %v695_v55 = vld [vmem:[%s1120_s5] sm:$0x3] }
  0xf0   :  { %639 = vmatmul.f32.vlgmr.msra.gmra.mxu2 %v373_v24  ;;  %659 = vmatmul.f32.vlgmr.msra.gmra.mxu3 %v374_v25 }
 0x164   :  { %v520_v54 = vpop.f32.mrf.mxu0  ;;  %v540_v20 = vpop.f32.mrf.mxu1 }
 0x165   :  { %v541_v21 = vadd.f32 %v540_v20, %v520_v54  ;;  %v731_v20 = vld [vmem:[#allocation10] sm:$0x3] }
 0x16b   :  { %v560_v22 = vpop.f32.mrf.mxu2  ;;  %v580_v23 = vpop.f32.mrf.mxu3 }
 0x16c   :  { %v561_v26 = vadd.f32 %v560_v22, %v541_v21  ;;  %v600_v28 = vpop.f32.mrf.mxu0  ;;  %v620_v29 = vpop.f32.mrf.mxu1 }
 0x16d   :  { %v621_v32 = vadd.f32 %v620_v29, %v600_v28 }
 0x16e   :  { %v581_v27 = vadd.f32 %v580_v23, %v561_v26  ;;  %v733_v26 = vperm.slane %v731_v20, 0 }
 0x170   :  { %v663_v30 = vrot.slane %v581_v27, 4 }
 0x172   :  { %v664_v31 = vadd.f32 %v663_v30, %v581_v27  ;;  %v745_v30 = vld [vmem:[%s1122_s7] sm:$0x3] }
 0x173   :  { %v640_v33 = vpop.f32.mrf.mxu2  ;;  %v660_v36 = vpop.f32.mrf.mxu3 }
 0x174   :  { %v665_v34 = vrot.slane %v664_v31, 2  ;;  %v641_v35 = vadd.f32 %v640_v33, %v621_v32  ;;  %v747_v33 = vperm.slane %v745_v30, 0 }
 0x176   :  { %v666_v39 = vadd.f32 %v665_v34, %v664_v31  ;;  %v661_v40 = vadd.f32 %v660_v36, %v641_v35  ;;  %v748_v34 = vperm.slane %v745_v30, 1 }
 0x178   :  { %v667_v41 = vrot.slane %v666_v39, 1  ;;  %v669_v42 = vrot.slane %v661_v40, 4 }
 0x17a   :  { %v668_v43 = vadd.f32 %v667_v41, %v666_v39  ;;  %v670_v44 = vadd.f32 %v669_v42, %v661_v40 }
 0x17c   :  { %v675_v45 = vmul.f32 0.125, %v668_v43  ;;  %v671_v46 = vrot.slane %v670_v44, 2 }
 0x17e   :  { %v677_v47 = vsub.f32 %v581_v27, %v675_v45  ;;  %v672_v48 = vadd.f32 %v671_v46, %v670_v44  ;;  %v734_v27 = vperm.slane %v731_v20, 1  ;;  %v807_v44 = vld [vmem:[#allocation2] ss:$0 sm:$0xff] }
 0x180   :  { %v679_v49 = vmul.f32 %v677_v47, %v677_v47  ;;  %v673_v50 = vrot.slane %v672_v48, 1 }
 0x182   :  { %v681_v38 = vrot.slane %v679_v49, 4  ;;  %v674_v51 = vadd.f32 %v673_v50, %v672_v48 }
 0x184   :  { %v682_v52 = vadd.f32 %v681_v38, %v679_v49  ;;  %v676_v53 = vmul.f32 0.125, %v674_v51 }
 0x186   :  { %v683_v58 = vrot.slane %v682_v52, 2  ;;  %v678_v59 = vsub.f32 %v661_v40, %v676_v53 }
 0x188   :  { %v684_v60 = vadd.f32 %v683_v58, %v682_v52  ;;  %v680_v61 = vmul.f32 %v678_v59, %v678_v59 }
 0x18a   :  { %v685_v62 = vrot.slane %v684_v60, 1  ;;  %v687_v63 = vrot.slane %v680_v61, 4 }
 0x18c   :  { %v686_v0 = vadd.f32 %v685_v62, %v684_v60  ;;  %v688_v56 = vadd.f32 %v687_v63, %v680_v61 }
 0x18e   :  { %v693_v57 = vmul.f32 0.125, %v686_v0  ;;  %v689_v37 = vrot.slane %v688_v56, 2 }
 0x190   :  { %v696_v1 = vadd.f32 1e-05, %v693_v57  ;;  %v690_v3 = vadd.f32 %v689_v37, %v688_v56 }
 0x192   :  { %816 = vrsqrt.f32 %v696_v1  ;;  %v691_v4 = vrot.slane %v690_v3, 1  ;;  %vm704_vm9 = vweird.f32 %v696_v1 }
 0x194   :  { %v692_v5 = vadd.f32 %v691_v4, %v690_v3 }
 0x196   :  { %v694_v6 = vmul.f32 0.125, %v692_v5 }
 0x198   :  { %v817_v7 = vpop.eup %816  ;;  %v697_v2 = vadd.f32 1e-05, %v694_v6 }
 0x199   :  { %v699_v8 = vmul.f32 %v817_v7, %v696_v1  ;;  %vm705_vm6 = vweird.f32 %v817_v7 }
 0x19a   :  { %818 = vrsqrt.f32 %v697_v2  ;;  %vm714_vm7 = vweird.f32 %v697_v2  ;;  %vm706_vm10 = vmor %vm704_vm9, %vm705_vm6 }
 0x19b   :  { %v700_v9 = vmul.f32 %v817_v7, %v699_v8 }
 0x19d   :  { %v701_v11 = vmul.f32 0.5, %v700_v9 }
 0x19f   :  { %v702_v14 = vsub.f32 1.5, %v701_v11 }
 0x1a0   :  { %v819_v10 = vpop.eup %818 }
 0x1a1   :  { %v709_v12 = vmul.f32 %v819_v10, %v697_v2  ;;  %vm715_vm5 = vweird.f32 %v819_v10  ;;  %v703_v17 = vmul.f32 %v817_v7, %v702_v14 }
 0x1a2   :  { %vm716_vm8 = vmor %vm714_vm7, %vm715_vm5 }
 0x1a3   :  { %v710_v13 = vmul.f32 %v819_v10, %v709_v12  ;;  %v707_v25 = vsel %vm706_vm10, %v817_v7, %v703_v17 }
 0x1a5   :  { %v711_v15 = vmul.f32 0.5, %v710_v13 }
 0x1a7   :  { %v712_v16 = vsub.f32 1.5, %v711_v15 }
 0x1a9   :  { %v713_v18 = vmul.f32 %v819_v10, %v712_v16 }
 0x1ab   :  { %v717_v19 = vsel %vm716_vm8, %v819_v10, %v713_v18 }
 0x1ac   :  { %v720_v24 = vrot.slane %v717_v19, 7 }
 0x1ae   :  { %v721_v54 = vsel %vm328_vm12, %v707_v25, %v720_v24 }
 0x1af   :  { %v723_v21 = vmul.f32 %v721_v54, %v695_v55 }
 0x1b1   :  { %v726_v22 = vperm.slane %v723_v21, 1  ;;  %v725_v23 = vperm.slane %v723_v21, 0 }
 0x1b3   :  { %v730_v28 = vmul.f32 %v726_v22, %v678_v59  ;;  %v729_v29 = vmul.f32 %v725_v23, %v677_v47 }
 0x1b5   :  { %v737_v31 = vadd.f32 %v733_v26, %v729_v29  ;;  %v738_v32 = vadd.f32 %v734_v27, %v730_v28 }
 0x1b7   :  { %vm739_vm11 = vcmp.ge.f32.partialorder %v737_v31, 0.0  ;;  %vm740_vm13 = vcmp.ge.f32.partialorder %v738_v32, 0.0  ;;  %v741_v35 = vmul.f32 0.01, %v737_v31  ;;  %v742_v36 = vmul.f32 0.01, %v738_v32 }
 0x1b9   :  { %v743_v39 = vsel %vm739_vm11, %v737_v31, %v741_v35  ;;  %v744_v40 = vsel %vm740_vm13, %v738_v32, %v742_v36 }
 0x1ba   :  { %v751_v41 = vmul.f32 %v747_v33, %v743_v39  ;;  %v752_v42 = vmul.f32 %v748_v34, %v744_v40 }
 0x1bc   :  { %v753_v43 = vadd.f32 %v752_v42, %v751_v41 }
 0x1be   :  { %754 = vadd.xlane.f32.xlu0 %v753_v43 }
 0x231   :  { %v755_v45 = vpop.xlane.xlu0 %754 }
 0x232   :  { %v760_v46 = vadd.f32 %v807_v44, %v755_v45 }
 0x234   :  { %v797_v47 = vmul.f32 -1.442695, %v760_v46 }
 0x236   :  { %820 = vpow2.f32 %v797_v47 }
 0x23c   :  { %v821_v48 = vpop.eup %820 }
 0x23d   :  { %v764_v49 = vadd.f32 1.0, %v821_v48 }
 0x23f   :  { %822 = vrcp.f32 %v764_v49  ;;  %v776_v52 = vand.u32 2147483648, %v764_v49  ;;  %v774_v58 = vand.u32 2147483647, %v764_v49  ;;  %vm770_vm14 = vweird.f32 %v764_v49 }
 0x241   :  { %v777_v60 = vor.u32 1.1754944e-38, %v776_v52  ;;  %vm775_vm1 = vcmp.eq.f32.partialorder %v774_v58, 8.507059e+37 }
 0x245   :  { %v823_v50 = vpop.eup %822 }
 0x246   :  { %v766_v38 = vmul.f32 %v823_v50, %v764_v49  ;;  %vm771_vm12 = vweird.f32 %v823_v50 }
 0x247   :  { %vm772_vm15 = vmor %vm770_vm14, %vm771_vm12 }
 0x248   :  { %v767_v51 = vsub.f32 1.0, %v766_v38 }
 0x24a   :  { %v768_v53 = vmul.f32 %v823_v50, %v767_v51 }
 0x24c   :  { %v769_v59 = vadd.f32 %v823_v50, %v768_v53 }
 0x24e   :  { %v773_v61 = vsel %vm772_vm15, %v823_v50, %v769_v59 }
 0x24f   :  { %v778_v62 = vsel %vm775_vm1, %v777_v60, %v773_v61 }
 0x250   :  { %781 = vst.msk [vmem:[%s1124_s9] sm:$0xff] %vm780_vm0, %v778_v62 }
 0x251   :  { %786 = vsyncpa [#allocation4], 1 }
 0x252   :  { %787 = vsyncpa [#allocation6], 1 }
 0x253   :  { %788 = vsyncpa [#allocation9], 1 }

</bundles_post_ra>
